<compile_context>
chip_gen: v7x
topology: tpu7x:2x2x1
jax: 0.10.0
libtpu: 0.0.40
codegen_flags: <defaults>
</compile_context>

<pallas_src>
import numpy as np
import jax
import jax.numpy as jnp
from jax import lax
from jax.experimental import pallas as pl
from jax.experimental.pallas import tpu as pltpu


# ------------------------------------------------------------------ trace-time helpers

def _bilinear_matrix(n_in, n_out):
    """1-D bilinear interpolation matrix (align_corners=True), shape [n_out, n_in]."""
    M = np.zeros((n_out, n_in), np.float32)
    if n_in == 1 or n_out == 1:
        src = np.zeros((n_out,), np.float64)
    else:
        src = np.arange(n_out, dtype=np.float64) * (n_in - 1) / (n_out - 1)
    i0 = np.clip(np.floor(src).astype(np.int64), 0, n_in - 1)
    i1 = np.minimum(i0 + 1, n_in - 1)
    frac = (src - i0).astype(np.float32)
    M[np.arange(n_out), i0] += 1.0 - frac
    M[np.arange(n_out), i1] += frac
    return M


def _band_conv_matrices(w_hwio, W):
    """Pack a 3x3 'SAME' conv (HWIO weights) into 3 banded matmul operands.

    Returns A of shape (3, W*Ci, W*Co) such that, for activations laid out as
    x[h, w*Ci + ci],    out = sum_dh  row_shift(x, dh-1) @ A[dh].
    The +/-1 W taps and the zero padding along W are baked into the band structure,
    so no strided slice/copy or padded scratch is needed in the kernel.
    """
    kh, kw, Ci, Co = w_hwio.shape
    A = np.zeros((kh, W * Ci, W * Co), np.float32)
    for dh in range(kh):
        for dw in range(kw):
            for wo in range(W):
                wi = wo + dw - 1
                if 0 <= wi < W:
                    A[dh, wi * Ci:(wi + 1) * Ci, wo * Co:(wo + 1) * Co] = w_hwio[dh, dw]
    return A


# ------------------------------------------------------------------ fused Pallas kernel

def _up_double_conv_kernel(x1_ref, x2_ref, wxt_ref, wyp_ref,
                           a1a_ref, a1b_ref, b1_ref, a2_ref, b2_ref, o_ref):
    f32 = jnp.float32
    cd = x1_ref.dtype                 # compute dtype (f32 or bf16), accumulation is f32
    H2 = o_ref.shape[0]

    def shift_rows(x, s):
        # y[h, :] = x[h + s, :], zero outside [0, H2)  (dh tap of the 3x3 conv)
        if s == 0:
            return x
        y = pltpu.roll(x.astype(f32), shift=(-s) % H2, axis=0)   # XLU sublane rotate
        h = lax.broadcasted_iota(jnp.int32, y.shape, 0)
        valid = jnp.logical_and(h + s >= 0, h + s < H2)
        return jnp.where(valid, y, 0.0).astype(x.dtype)

    # fused bilinear 2x upsample (align_corners=True) + glue zero-pad, all on the MXU:
    #   (H1, W1*C1) @ (W1*C1, W2*C1) -> (H1, W2*C1);  (H2, H1) @ ... -> (H2, W2*C1)
    t = jnp.dot(x1_ref[...], wxt_ref[...], preferred_element_type=f32).astype(cd)
    x1u = jnp.dot(wyp_ref[...], t, preferred_element_type=f32).astype(cd)
    x2 = x2_ref[...]

    # conv1 (+ folded BN) + ReLU; the channel concat [x2, x1u] is implicit:
    # two matmul contributions per dh tap (one per source), summed into one accumulator.
    acc1 = jnp.zeros((H2, b1_ref.shape[-1]), f32)
    for dh in range(3):
        s = dh - 1
        acc1 += jnp.dot(shift_rows(x2, s), a1a_ref[dh], preferred_element_type=f32)
        acc1 += jnp.dot(shift_rows(x1u, s), a1b_ref[dh], preferred_element_type=f32)
    y1 = jnp.maximum(acc1 + b1_ref[...], 0.0).astype(cd)

    # conv2 (+ folded BN) + ReLU
    acc2 = jnp.zeros((H2, b2_ref.shape[-1]), f32)
    for dh in range(3):
        acc2 += jnp.dot(shift_rows(y1, dh - 1), a2_ref[dh], preferred_element_type=f32)
    o_ref[...] = jnp.maximum(acc2 + b2_ref[...], 0.0).astype(o_ref.dtype)


# ------------------------------------------------------------------ wrapper (Up.forward)

def up_forward(x1, x2, params, compute_dtype=jnp.float32):
    """x1, x2 in PyTorch NCHW; returns NCHW output of Up(in_ch, out_ch, bilinear=True).

    compute_dtype=jnp.bfloat16 runs the matmuls on the bf16 MXU path (f32 accumulation).
    """
    w1, s1, b1, w2, s2, b2 = params
    N, C1, H1, W1 = x1.shape
    _, C2, H2, W2 = x2.shape
    Cmid = w1.shape[-1]
    Cout = w2.shape[-1]
    Hu, Wu = 2 * H1, 2 * W1
    dy, dx = H2 - Hu, W2 - Wu
    # TODO(synk): negative glue padding (x2 smaller than the upsampled x1) not supported.
    assert dy >= 0 and dx >= 0

    # ---- host-side constant packing (trace-time numpy; cache in production) ----
    WyP = np.zeros((H2, H1), np.float32)                    # H-interp + top/bottom pad
    WyP[dy // 2: dy // 2 + Hu, :] = _bilinear_matrix(H1, Hu)
    WxP = np.zeros((W2, W1), np.float32)                    # W-interp + left/right pad
    WxP[dx // 2: dx // 2 + Wu, :] = _bilinear_matrix(W1, Wu)
    wxt = np.kron(WxP.T, np.eye(C1, dtype=np.float32))      # (W1*C1, W2*C1)

    # fold eval-mode BN scale into the conv weights (bias stays separate)
    w1f = np.asarray(w1) * np.asarray(s1).reshape(1, 1, 1, -1)
    w2f = np.asarray(w2) * np.asarray(s2).reshape(1, 1, 1, -1)
    a1a = _band_conv_matrices(w1f[:, :, :C2, :], W2)         # x2 channels come first
    a1b = _band_conv_matrices(w1f[:, :, C2:, :], W2)         # then the upsampled x1
    a2 = _band_conv_matrices(w2f, W2)
    b1t = np.tile(np.asarray(b1).reshape(-1), W2).reshape(1, W2 * Cmid)
    b2t = np.tile(np.asarray(b2).reshape(-1), W2).reshape(1, W2 * Cout)

    # ---- layout plumbing: NCHW -> (N, H, W*C) slabs (W*C on the lane axis) ----
    cd = compute_dtype
    x1f = jnp.transpose(x1, (0, 2, 3, 1)).reshape(N, H1, W1 * C1).astype(cd)
    x2f = jnp.transpose(x2, (0, 2, 3, 1)).reshape(N, H2, W2 * C2).astype(cd)

    # TODO(synk): for large feature maps the banded-matmul formulation (W*C contraction)
    #             should switch to per-tap matmuls with spatial tiling + a 1-row halo.
    out = pl.pallas_call(
        _up_double_conv_kernel,
        out_shape=jax.ShapeDtypeStruct((N, H2, W2 * Cout), jnp.float32),
        grid=(N,),
        in_specs=[
            pl.BlockSpec((None, H1, W1 * C1), lambda n: (n, 0, 0)),       # x1
            pl.BlockSpec((None, H2, W2 * C2), lambda n: (n, 0, 0)),       # x2
            pl.BlockSpec((W1 * C1, W2 * C1), lambda n: (0, 0)),           # W-interp (kron)
            pl.BlockSpec((H2, H1), lambda n: (0, 0)),                     # H-interp
            pl.BlockSpec((3, W2 * C2, W2 * Cmid), lambda n: (0, 0, 0)),   # conv1 (x2 part)
            pl.BlockSpec((3, W2 * C1, W2 * Cmid), lambda n: (0, 0, 0)),   # conv1 (x1 part)
            pl.BlockSpec((1, W2 * Cmid), lambda n: (0, 0)),               # bias1 (tiled)
            pl.BlockSpec((3, W2 * Cmid, W2 * Cout), lambda n: (0, 0, 0)),  # conv2
            pl.BlockSpec((1, W2 * Cout), lambda n: (0, 0)),               # bias2 (tiled)
        ],
        out_specs=pl.BlockSpec((None, H2, W2 * Cout), lambda n: (n, 0, 0)),
        compiler_params=pltpu.CompilerParams(
            dimension_semantics=("parallel",),
            vmem_limit_bytes=32 * 1024 * 1024),
    )(x1f, x2f,
      jnp.asarray(wxt, cd), jnp.asarray(WyP, cd),
      jnp.asarray(a1a, cd), jnp.asarray(a1b, cd), jnp.asarray(b1t, jnp.float32),
      jnp.asarray(a2, cd), jnp.asarray(b2t, jnp.float32))

    return jnp.transpose(out.reshape(N, H2, W2, Cout), (0, 3, 1, 2))


# ------------------------------------------------------------------ params & reference

def init_params(key, in_ch, out_ch, eps=1e-5):
    ks = jax.random.split(key, 10)
    # conv weights in HWIO; conv bias + eval-mode BN folded into (scale, bias)
    # TODO(synk): training-mode BatchNorm (batch statistics) is not implemented.
    w1 = 0.1 * jax.random.normal(ks[0], (3, 3, in_ch, out_ch), jnp.float32)
    cb1 = 0.1 * jax.random.normal(ks[1], (out_ch,), jnp.float32)
    g1 = 1.0 + 0.1 * jax.random.normal(ks[2], (out_ch,), jnp.float32)
    be1 = 0.1 * jax.random.normal(ks[3], (out_ch,), jnp.float32)
    m1 = 0.1 * jax.random.normal(ks[4], (out_ch,), jnp.float32)
    v1 = 1.0 + 0.1 * jax.random.uniform(ks[5], (out_ch,), jnp.float32)

    w2 = 0.1 * jax.random.normal(ks[6], (3, 3, out_ch, out_ch), jnp.float32)
    cb2 = 0.1 * jax.random.normal(ks[7], (out_ch,), jnp.float32)
    g2 = 1.0 + 0.1 * jax.random.normal(ks[8], (out_ch,), jnp.float32)
    be2 = 0.1 * jax.random.normal(ks[9], (out_ch,), jnp.float32)
    m2 = jnp.zeros((out_ch,), jnp.float32)
    v2 = jnp.ones((out_ch,), jnp.float32)

    s1 = g1 / jnp.sqrt(v1 + eps)
    b1 = be1 + (cb1 - m1) * s1
    s2 = g2 / jnp.sqrt(v2 + eps)
    b2 = be2 + (cb2 - m2) * s2
    return (w1, s1.reshape(1, -1), b1.reshape(1, -1),
            w2, s2.reshape(1, -1), b2.reshape(1, -1))


def ref_forward(x1, x2, params):
    """Pure-JAX reference mirroring Up.forward semantics (eval-mode BN)."""
    w1, s1, b1, w2, s2, b2 = params
    N, C1, H1, W1 = x1.shape
    _, C2, H2, W2 = x2.shape
    Hu, Wu = 2 * H1, 2 * W1
    Wy = _bilinear_matrix(H1, Hu)
    Wx = _bilinear_matrix(W1, Wu)
    t = jnp.einsum('oh,nchw->ncow', Wy, x1)
    x1u = jnp.einsum('pw,ncow->ncop', Wx, t)
    dy, dx = H2 - Hu, W2 - Wu
    x1u = jnp.pad(x1u, ((0, 0), (0, 0),
                        (dy // 2, dy - dy // 2), (dx // 2, dx - dx // 2)))
    x = jnp.concatenate([x2, x1u], axis=1)
    xh = jnp.transpose(x, (0, 2, 3, 1))

    def conv_bn_relu(xh, w, s, b):
        y = lax.conv_general_dilated(xh, w, (1, 1), 'SAME',
                                     dimension_numbers=('NHWC', 'HWIO', 'NHWC'))
        return jnp.maximum(y * s.reshape(-1) + b.reshape(-1), 0.0)

    y = conv_bn_relu(xh, w1, s1, b1)
    y = conv_bn_relu(y, w2, s2, b2)
    return jnp.transpose(y, (0, 3, 1, 2))


# ------------------------------------------------------------------ main

if __name__ == "__main__":
    key = jax.random.PRNGKey(0)
    k1, k2, kp = jax.random.split(key, 3)

    in_ch, out_ch = 8, 4
    # x1: low-res decoder feature (in_ch//2 channels), x2: skip feature (in_ch//2 channels)
    x1 = jax.random.normal(k1, (2, in_ch // 2, 8, 8), jnp.float32)
    x2 = jax.random.normal(k2, (2, in_ch // 2, 16, 16), jnp.float32)
    params = init_params(kp, in_ch, out_ch)

    ref = ref_forward(x1, x2, params)

    # full-precision path (tight check)
    out = jax.block_until_ready(up_forward(x1, x2, params))
    assert out.shape == (2, out_ch, 16, 16), out.shape
    assert np.allclose(np.asarray(out), np.asarray(ref), atol=1e-3, rtol=1e-3)

    # bf16 MXU path (f32 accumulation), looser tolerance
    out_bf16 = jax.block_until_ready(
        up_forward(x1, x2, params, compute_dtype=jnp.bfloat16))
    assert np.allclose(np.asarray(out_bf16), np.asarray(ref), atol=5e-2, rtol=5e-2)

    print("KERNEL_OK")
</pallas_src>

<mosaic_0001>
module attributes {stable_mosaic.version = 11 : i64} {
  func.func @_up_double_conv_kernel(%arg0: i32, %arg1: memref<1x8x32xf32, #tpu.memory_space<vmem>>, %arg2: memref<1x16x64xf32, #tpu.memory_space<vmem>>, %arg3: memref<32x64xf32, #tpu.memory_space<vmem>>, %arg4: memref<16x8xf32, #tpu.memory_space<vmem>>, %arg5: memref<3x64x64xf32, #tpu.memory_space<vmem>>, %arg6: memref<3x64x64xf32, #tpu.memory_space<vmem>>, %arg7: memref<1x64xf32, #tpu.memory_space<vmem>>, %arg8: memref<3x64x64xf32, #tpu.memory_space<vmem>>, %arg9: memref<1x64xf32, #tpu.memory_space<vmem>>, %arg10: memref<1x16x64xf32, #tpu.memory_space<vmem>>) attributes {dimension_semantics = [#tpu.dimension_semantics<parallel>], iteration_bounds = array<i64: 2>, scalar_prefetch = 0 : i64, scratch_operands = 0 : i64, tpu.core_type = #tpu.core_type<tc>, window_params = [{transform_indices = @transform_0, window_bounds = array<i64: 1, 8, 32>}, {transform_indices = @transform_1, window_bounds = array<i64: 1, 16, 64>}, {pipeline_mode = #tpu.pipeline_mode<synchronous>, transform_indices = @transform_2, window_bounds = array<i64: 32, 64>}, {pipeline_mode = #tpu.pipeline_mode<synchronous>, transform_indices = @transform_3, window_bounds = array<i64: 16, 8>}, {pipeline_mode = #tpu.pipeline_mode<synchronous>, transform_indices = @transform_4, window_bounds = array<i64: 3, 64, 64>}, {pipeline_mode = #tpu.pipeline_mode<synchronous>, transform_indices = @transform_5, window_bounds = array<i64: 3, 64, 64>}, {pipeline_mode = #tpu.pipeline_mode<synchronous>, transform_indices = @transform_6, window_bounds = array<i64: 1, 64>}, {pipeline_mode = #tpu.pipeline_mode<synchronous>, transform_indices = @transform_7, window_bounds = array<i64: 3, 64, 64>}, {pipeline_mode = #tpu.pipeline_mode<synchronous>, transform_indices = @transform_8, window_bounds = array<i64: 1, 64>}, {transform_indices = @transform_9, window_bounds = array<i64: 1, 16, 64>}]} {
    %c0 = arith.constant 0 : index
    %c0_0 = arith.constant 0 : index
    %c0_1 = arith.constant 0 : index
    %0 = vector.load %arg1[%c0, %c0_0, %c0_1] : memref<1x8x32xf32, #tpu.memory_space<vmem>>, vector<1x8x32xf32>
    %1 = vector.shape_cast %0 : vector<1x8x32xf32> to vector<8x32xf32>
    %c0_2 = arith.constant 0 : index
    %c0_3 = arith.constant 0 : index
    %2 = vector.load %arg3[%c0_2, %c0_3] : memref<32x64xf32, #tpu.memory_space<vmem>>, vector<32x64xf32>
    %cst = arith.constant dense<0.000000e+00> : vector<8x64xf32>
    %3 = tpu.matmul %1, %2, %cst {dimension_numbers = #tpu.dot_dimension_numbers<[1], [0], [0], [1], [0, 0, 1, 1], [], []>} : vector<8x32xf32>, vector<32x64xf32>, vector<8x64xf32> -> vector<8x64xf32>
    %c0_4 = arith.constant 0 : index
    %c0_5 = arith.constant 0 : index
    %4 = vector.load %arg4[%c0_4, %c0_5] : memref<16x8xf32, #tpu.memory_space<vmem>>, vector<16x8xf32>
    %cst_6 = arith.constant dense<0.000000e+00> : vector<16x64xf32>
    %5 = tpu.matmul %4, %3, %cst_6 {dimension_numbers = #tpu.dot_dimension_numbers<[1], [0], [0], [1], [0, 0, 1, 1], [], []>} : vector<16x8xf32>, vector<8x64xf32>, vector<16x64xf32> -> vector<16x64xf32>
    %c0_7 = arith.constant 0 : index
    %c0_8 = arith.constant 0 : index
    %c0_9 = arith.constant 0 : index
    %6 = vector.load %arg2[%c0_7, %c0_8, %c0_9] : memref<1x16x64xf32, #tpu.memory_space<vmem>>, vector<1x16x64xf32>
    %7 = vector.shape_cast %6 : vector<1x16x64xf32> to vector<16x64xf32>
    %cst_10 = arith.constant 0.000000e+00 : f32
    %8 = vector.broadcast %cst_10 : f32 to vector<16x64xf32>
    %c1_i32 = arith.constant 1 : i32
    %9 = tpu.dynamic_rotate %7 by %c1_i32 dim 0 : vector<16x64xf32>, i32 -> vector<16x64xf32>
    %10 = tpu.iota {dimensions = array<i32: 0>} : vector<16x64xi32>
    %c-1_i32 = arith.constant -1 : i32
    %11 = vector.broadcast %c-1_i32 : i32 to vector<16x64xi32>
    %12 = arith.addi %10, %11 : vector<16x64xi32>
    %c0_i32 = arith.constant 0 : i32
    %13 = vector.broadcast %c0_i32 : i32 to vector<16x64xi32>
    %14 = arith.cmpi sge, %12, %13 : vector<16x64xi32>
    %c-1_i32_11 = arith.constant -1 : i32
    %15 = vector.broadcast %c-1_i32_11 : i32 to vector<16x64xi32>
    %16 = arith.addi %10, %15 : vector<16x64xi32>
    %c16_i32 = arith.constant 16 : i32
    %17 = vector.broadcast %c16_i32 : i32 to vector<16x64xi32>
    %18 = arith.cmpi slt, %16, %17 : vector<16x64xi32>
    %19 = arith.andi %14, %18 : vector<16x64xi1>
    %cst_12 = arith.constant 0.000000e+00 : f32
    %20 = vector.broadcast %cst_12 : f32 to vector<16x64xf32>
    %21 = arith.select %19, %9, %20 : vector<16x64xi1>, vector<16x64xf32>
    %c0_13 = arith.constant 0 : index
    %c0_14 = arith.constant 0 : index
    %c0_15 = arith.constant 0 : index
    %22 = vector.load %arg5[%c0_13, %c0_14, %c0_15] : memref<3x64x64xf32, #tpu.memory_space<vmem>>, vector<1x64x64xf32>
    %23 = vector.shape_cast %22 : vector<1x64x64xf32> to vector<64x64xf32>
    %cst_16 = arith.constant dense<0.000000e+00> : vector<16x64xf32>
    %24 = tpu.matmul %21, %23, %cst_16 {dimension_numbers = #tpu.dot_dimension_numbers<[1], [0], [0], [1], [0, 0, 1, 1], [], []>} : vector<16x64xf32>, vector<64x64xf32>, vector<16x64xf32> -> vector<16x64xf32>
    %25 = arith.addf %8, %24 : vector<16x64xf32>
    %c1_i32_17 = arith.constant 1 : i32
    %26 = tpu.dynamic_rotate %5 by %c1_i32_17 dim 0 : vector<16x64xf32>, i32 -> vector<16x64xf32>
    %27 = tpu.iota {dimensions = array<i32: 0>} : vector<16x64xi32>
    %c-1_i32_18 = arith.constant -1 : i32
    %28 = vector.broadcast %c-1_i32_18 : i32 to vector<16x64xi32>
    %29 = arith.addi %27, %28 : vector<16x64xi32>
    %c0_i32_19 = arith.constant 0 : i32
    %30 = vector.broadcast %c0_i32_19 : i32 to vector<16x64xi32>
    %31 = arith.cmpi sge, %29, %30 : vector<16x64xi32>
    %c-1_i32_20 = arith.constant -1 : i32
    %32 = vector.broadcast %c-1_i32_20 : i32 to vector<16x64xi32>
    %33 = arith.addi %27, %32 : vector<16x64xi32>
    %c16_i32_21 = arith.constant 16 : i32
    %34 = vector.broadcast %c16_i32_21 : i32 to vector<16x64xi32>
    %35 = arith.cmpi slt, %33, %34 : vector<16x64xi32>
    %36 = arith.andi %31, %35 : vector<16x64xi1>
    %cst_22 = arith.constant 0.000000e+00 : f32
    %37 = vector.broadcast %cst_22 : f32 to vector<16x64xf32>
    %38 = arith.select %36, %26, %37 : vector<16x64xi1>, vector<16x64xf32>
    %c0_23 = arith.constant 0 : index
    %c0_24 = arith.constant 0 : index
    %c0_25 = arith.constant 0 : index
    %39 = vector.load %arg6[%c0_23, %c0_24, %c0_25] : memref<3x64x64xf32, #tpu.memory_space<vmem>>, vector<1x64x64xf32>
    %40 = vector.shape_cast %39 : vector<1x64x64xf32> to vector<64x64xf32>
    %cst_26 = arith.constant dense<0.000000e+00> : vector<16x64xf32>
    %41 = tpu.matmul %38, %40, %cst_26 {dimension_numbers = #tpu.dot_dimension_numbers<[1], [0], [0], [1], [0, 0, 1, 1], [], []>} : vector<16x64xf32>, vector<64x64xf32>, vector<16x64xf32> -> vector<16x64xf32>
    %42 = arith.addf %25, %41 : vector<16x64xf32>
    %c1 = arith.constant 1 : index
    %c0_27 = arith.constant 0 : index
    %c0_28 = arith.constant 0 : index
    %43 = vector.load %arg5[%c1, %c0_27, %c0_28] : memref<3x64x64xf32, #tpu.memory_space<vmem>>, vector<1x64x64xf32>
    %44 = vector.shape_cast %43 : vector<1x64x64xf32> to vector<64x64xf32>
    %cst_29 = arith.constant dense<0.000000e+00> : vector<16x64xf32>
    %45 = tpu.matmul %7, %44, %cst_29 {dimension_numbers = #tpu.dot_dimension_numbers<[1], [0], [0], [1], [0, 0, 1, 1], [], []>} : vector<16x64xf32>, vector<64x64xf32>, vector<16x64xf32> -> vector<16x64xf32>
    %46 = arith.addf %42, %45 : vector<16x64xf32>
    %c1_30 = arith.constant 1 : index
    %c0_31 = arith.constant 0 : index
    %c0_32 = arith.constant 0 : index
    %47 = vector.load %arg6[%c1_30, %c0_31, %c0_32] : memref<3x64x64xf32, #tpu.memory_space<vmem>>, vector<1x64x64xf32>
    %48 = vector.shape_cast %47 : vector<1x64x64xf32> to vector<64x64xf32>
    %cst_33 = arith.constant dense<0.000000e+00> : vector<16x64xf32>
    %49 = tpu.matmul %5, %48, %cst_33 {dimension_numbers = #tpu.dot_dimension_numbers<[1], [0], [0], [1], [0, 0, 1, 1], [], []>} : vector<16x64xf32>, vector<64x64xf32>, vector<16x64xf32> -> vector<16x64xf32>
    %50 = arith.addf %46, %49 : vector<16x64xf32>
    %c15_i32 = arith.constant 15 : i32
    %51 = tpu.dynamic_rotate %7 by %c15_i32 dim 0 : vector<16x64xf32>, i32 -> vector<16x64xf32>
    %52 = tpu.iota {dimensions = array<i32: 0>} : vector<16x64xi32>
    %c1_i32_34 = arith.constant 1 : i32
    %53 = vector.broadcast %c1_i32_34 : i32 to vector<16x64xi32>
    %54 = arith.addi %52, %53 : vector<16x64xi32>
    %c0_i32_35 = arith.constant 0 : i32
    %55 = vector.broadcast %c0_i32_35 : i32 to vector<16x64xi32>
    %56 = arith.cmpi sge, %54, %55 : vector<16x64xi32>
    %c1_i32_36 = arith.constant 1 : i32
    %57 = vector.broadcast %c1_i32_36 : i32 to vector<16x64xi32>
    %58 = arith.addi %52, %57 : vector<16x64xi32>
    %c16_i32_37 = arith.constant 16 : i32
    %59 = vector.broadcast %c16_i32_37 : i32 to vector<16x64xi32>
    %60 = arith.cmpi slt, %58, %59 : vector<16x64xi32>
    %61 = arith.andi %56, %60 : vector<16x64xi1>
    %cst_38 = arith.constant 0.000000e+00 : f32
    %62 = vector.broadcast %cst_38 : f32 to vector<16x64xf32>
    %63 = arith.select %61, %51, %62 : vector<16x64xi1>, vector<16x64xf32>
    %c2 = arith.constant 2 : index
    %c0_39 = arith.constant 0 : index
    %c0_40 = arith.constant 0 : index
    %64 = vector.load %arg5[%c2, %c0_39, %c0_40] : memref<3x64x64xf32, #tpu.memory_space<vmem>>, vector<1x64x64xf32>
    %65 = vector.shape_cast %64 : vector<1x64x64xf32> to vector<64x64xf32>
    %cst_41 = arith.constant dense<0.000000e+00> : vector<16x64xf32>
    %66 = tpu.matmul %63, %65, %cst_41 {dimension_numbers = #tpu.dot_dimension_numbers<[1], [0], [0], [1], [0, 0, 1, 1], [], []>} : vector<16x64xf32>, vector<64x64xf32>, vector<16x64xf32> -> vector<16x64xf32>
    %67 = arith.addf %50, %66 : vector<16x64xf32>
    %c15_i32_42 = arith.constant 15 : i32
    %68 = tpu.dynamic_rotate %5 by %c15_i32_42 dim 0 : vector<16x64xf32>, i32 -> vector<16x64xf32>
    %69 = tpu.iota {dimensions = array<i32: 0>} : vector<16x64xi32>
    %c1_i32_43 = arith.constant 1 : i32
    %70 = vector.broadcast %c1_i32_43 : i32 to vector<16x64xi32>
    %71 = arith.addi %69, %70 : vector<16x64xi32>
    %c0_i32_44 = arith.constant 0 : i32
    %72 = vector.broadcast %c0_i32_44 : i32 to vector<16x64xi32>
    %73 = arith.cmpi sge, %71, %72 : vector<16x64xi32>
    %c1_i32_45 = arith.constant 1 : i32
    %74 = vector.broadcast %c1_i32_45 : i32 to vector<16x64xi32>
    %75 = arith.addi %69, %74 : vector<16x64xi32>
    %c16_i32_46 = arith.constant 16 : i32
    %76 = vector.broadcast %c16_i32_46 : i32 to vector<16x64xi32>
    %77 = arith.cmpi slt, %75, %76 : vector<16x64xi32>
    %78 = arith.andi %73, %77 : vector<16x64xi1>
    %cst_47 = arith.constant 0.000000e+00 : f32
    %79 = vector.broadcast %cst_47 : f32 to vector<16x64xf32>
    %80 = arith.select %78, %68, %79 : vector<16x64xi1>, vector<16x64xf32>
    %c2_48 = arith.constant 2 : index
    %c0_49 = arith.constant 0 : index
    %c0_50 = arith.constant 0 : index
    %81 = vector.load %arg6[%c2_48, %c0_49, %c0_50] : memref<3x64x64xf32, #tpu.memory_space<vmem>>, vector<1x64x64xf32>
    %82 = vector.shape_cast %81 : vector<1x64x64xf32> to vector<64x64xf32>
    %cst_51 = arith.constant dense<0.000000e+00> : vector<16x64xf32>
    %83 = tpu.matmul %80, %82, %cst_51 {dimension_numbers = #tpu.dot_dimension_numbers<[1], [0], [0], [1], [0, 0, 1, 1], [], []>} : vector<16x64xf32>, vector<64x64xf32>, vector<16x64xf32> -> vector<16x64xf32>
    %84 = arith.addf %67, %83 : vector<16x64xf32>
    %c0_52 = arith.constant 0 : index
    %c0_53 = arith.constant 0 : index
    %85 = vector.load %arg7[%c0_52, %c0_53] : memref<1x64xf32, #tpu.memory_space<vmem>>, vector<1x64xf32>
    %86 = vector.broadcast %85 : vector<1x64xf32> to vector<16x64xf32>
    %87 = arith.addf %84, %86 : vector<16x64xf32>
    %cst_54 = arith.constant 0.000000e+00 : f32
    %88 = vector.broadcast %cst_54 : f32 to vector<16x64xf32>
    %89 = arith.maximumf %87, %88 : vector<16x64xf32>
    %cst_55 = arith.constant 0.000000e+00 : f32
    %90 = vector.broadcast %cst_55 : f32 to vector<16x64xf32>
    %c1_i32_56 = arith.constant 1 : i32
    %91 = tpu.dynamic_rotate %89 by %c1_i32_56 dim 0 : vector<16x64xf32>, i32 -> vector<16x64xf32>
    %92 = tpu.iota {dimensions = array<i32: 0>} : vector<16x64xi32>
    %c-1_i32_57 = arith.constant -1 : i32
    %93 = vector.broadcast %c-1_i32_57 : i32 to vector<16x64xi32>
    %94 = arith.addi %92, %93 : vector<16x64xi32>
    %c0_i32_58 = arith.constant 0 : i32
    %95 = vector.broadcast %c0_i32_58 : i32 to vector<16x64xi32>
    %96 = arith.cmpi sge, %94, %95 : vector<16x64xi32>
    %c-1_i32_59 = arith.constant -1 : i32
    %97 = vector.broadcast %c-1_i32_59 : i32 to vector<16x64xi32>
    %98 = arith.addi %92, %97 : vector<16x64xi32>
    %c16_i32_60 = arith.constant 16 : i32
    %99 = vector.broadcast %c16_i32_60 : i32 to vector<16x64xi32>
    %100 = arith.cmpi slt, %98, %99 : vector<16x64xi32>
    %101 = arith.andi %96, %100 : vector<16x64xi1>
    %cst_61 = arith.constant 0.000000e+00 : f32
    %102 = vector.broadcast %cst_61 : f32 to vector<16x64xf32>
    %103 = arith.select %101, %91, %102 : vector<16x64xi1>, vector<16x64xf32>
    %c0_62 = arith.constant 0 : index
    %c0_63 = arith.constant 0 : index
    %c0_64 = arith.constant 0 : index
    %104 = vector.load %arg8[%c0_62, %c0_63, %c0_64] : memref<3x64x64xf32, #tpu.memory_space<vmem>>, vector<1x64x64xf32>
    %105 = vector.shape_cast %104 : vector<1x64x64xf32> to vector<64x64xf32>
    %cst_65 = arith.constant dense<0.000000e+00> : vector<16x64xf32>
    %106 = tpu.matmul %103, %105, %cst_65 {dimension_numbers = #tpu.dot_dimension_numbers<[1], [0], [0], [1], [0, 0, 1, 1], [], []>} : vector<16x64xf32>, vector<64x64xf32>, vector<16x64xf32> -> vector<16x64xf32>
    %107 = arith.addf %90, %106 : vector<16x64xf32>
    %c1_66 = arith.constant 1 : index
    %c0_67 = arith.constant 0 : index
    %c0_68 = arith.constant 0 : index
    %108 = vector.load %arg8[%c1_66, %c0_67, %c0_68] : memref<3x64x64xf32, #tpu.memory_space<vmem>>, vector<1x64x64xf32>
    %109 = vector.shape_cast %108 : vector<1x64x64xf32> to vector<64x64xf32>
    %cst_69 = arith.constant dense<0.000000e+00> : vector<16x64xf32>
    %110 = tpu.matmul %89, %109, %cst_69 {dimension_numbers = #tpu.dot_dimension_numbers<[1], [0], [0], [1], [0, 0, 1, 1], [], []>} : vector<16x64xf32>, vector<64x64xf32>, vector<16x64xf32> -> vector<16x64xf32>
    %111 = arith.addf %107, %110 : vector<16x64xf32>
    %c15_i32_70 = arith.constant 15 : i32
    %112 = tpu.dynamic_rotate %89 by %c15_i32_70 dim 0 : vector<16x64xf32>, i32 -> vector<16x64xf32>
    %113 = tpu.iota {dimensions = array<i32: 0>} : vector<16x64xi32>
    %c1_i32_71 = arith.constant 1 : i32
    %114 = vector.broadcast %c1_i32_71 : i32 to vector<16x64xi32>
    %115 = arith.addi %113, %114 : vector<16x64xi32>
    %c0_i32_72 = arith.constant 0 : i32
    %116 = vector.broadcast %c0_i32_72 : i32 to vector<16x64xi32>
    %117 = arith.cmpi sge, %115, %116 : vector<16x64xi32>
    %c1_i32_73 = arith.constant 1 : i32
    %118 = vector.broadcast %c1_i32_73 : i32 to vector<16x64xi32>
    %119 = arith.addi %113, %118 : vector<16x64xi32>
    %c16_i32_74 = arith.constant 16 : i32
    %120 = vector.broadcast %c16_i32_74 : i32 to vector<16x64xi32>
    %121 = arith.cmpi slt, %119, %120 : vector<16x64xi32>
    %122 = arith.andi %117, %121 : vector<16x64xi1>
    %cst_75 = arith.constant 0.000000e+00 : f32
    %123 = vector.broadcast %cst_75 : f32 to vector<16x64xf32>
    %124 = arith.select %122, %112, %123 : vector<16x64xi1>, vector<16x64xf32>
    %c2_76 = arith.constant 2 : index
    %c0_77 = arith.constant 0 : index
    %c0_78 = arith.constant 0 : index
    %125 = vector.load %arg8[%c2_76, %c0_77, %c0_78] : memref<3x64x64xf32, #tpu.memory_space<vmem>>, vector<1x64x64xf32>
    %126 = vector.shape_cast %125 : vector<1x64x64xf32> to vector<64x64xf32>
    %cst_79 = arith.constant dense<0.000000e+00> : vector<16x64xf32>
    %127 = tpu.matmul %124, %126, %cst_79 {dimension_numbers = #tpu.dot_dimension_numbers<[1], [0], [0], [1], [0, 0, 1, 1], [], []>} : vector<16x64xf32>, vector<64x64xf32>, vector<16x64xf32> -> vector<16x64xf32>
    %128 = arith.addf %111, %127 : vector<16x64xf32>
    %c0_80 = arith.constant 0 : index
    %c0_81 = arith.constant 0 : index
    %129 = vector.load %arg9[%c0_80, %c0_81] : memref<1x64xf32, #tpu.memory_space<vmem>>, vector<1x64xf32>
    %130 = vector.broadcast %129 : vector<1x64xf32> to vector<16x64xf32>
    %131 = arith.addf %128, %130 : vector<16x64xf32>
    %cst_82 = arith.constant 0.000000e+00 : f32
    %132 = vector.broadcast %cst_82 : f32 to vector<16x64xf32>
    %133 = arith.maximumf %131, %132 : vector<16x64xf32>
    %c0_83 = arith.constant 0 : index
    %c0_84 = arith.constant 0 : index
    %c0_85 = arith.constant 0 : index
    %134 = vector.load %arg10[%c0_83, %c0_84, %c0_85] : memref<1x16x64xf32, #tpu.memory_space<vmem>>, vector<1x16x64xf32>
    %135 = vector.shape_cast %134 : vector<1x16x64xf32> to vector<16x64xf32>
    %136 = vector.shape_cast %133 : vector<16x64xf32> to vector<1x16x64xf32>
    tpu.vector_store %arg10[%c0_83, %c0_84, %c0_85], %136 {strides = array<i32>} : memref<1x16x64xf32, #tpu.memory_space<vmem>>, vector<1x16x64xf32>,
    return
  }
  func.func @transform_0(%arg0: i32) -> (i32, i32, i32) {
    %c0_i32 = arith.constant 0 : i32
    %c0_i32_0 = arith.constant 0 : i32
    %c0_i32_1 = arith.constant 0 : i32
    return %arg0, %c0_i32, %c0_i32_0 : i32, i32, i32
  }
  func.func @transform_1(%arg0: i32) -> (i32, i32, i32) {
    %c0_i32 = arith.constant 0 : i32
    %c0_i32_0 = arith.constant 0 : i32
    %c0_i32_1 = arith.constant 0 : i32
    return %arg0, %c0_i32, %c0_i32_0 : i32, i32, i32
  }
  func.func @transform_2(%arg0: i32) -> (i32, i32) {
    %c0_i32 = arith.constant 0 : i32
    %c0_i32_0 = arith.constant 0 : i32
    %c0_i32_1 = arith.constant 0 : i32
    return %c0_i32, %c0_i32_0 : i32, i32
  }
  func.func @transform_3(%arg0: i32) -> (i32, i32) {
    %c0_i32 = arith.constant 0 : i32
    %c0_i32_0 = arith.constant 0 : i32
    %c0_i32_1 = arith.constant 0 : i32
    return %c0_i32, %c0_i32_0 : i32, i32
  }
  func.func @transform_4(%arg0: i32) -> (i32, i32, i32) {
    %c0_i32 = arith.constant 0 : i32
    %c0_i32_0 = arith.constant 0 : i32
    %c0_i32_1 = arith.constant 0 : i32
    %c0_i32_2 = arith.constant 0 : i32
    return %c0_i32, %c0_i32_0, %c0_i32_1 : i32, i32, i32
  }
  func.func @transform_5(%arg0: i32) -> (i32, i32, i32) {
    %c0_i32 = arith.constant 0 : i32
    %c0_i32_0 = arith.constant 0 : i32
    %c0_i32_1 = arith.constant 0 : i32
    %c0_i32_2 = arith.constant 0 : i32
    return %c0_i32, %c0_i32_0, %c0_i32_1 : i32, i32, i32
  }
  func.func @transform_6(%arg0: i32) -> (i32, i32) {
    %c0_i32 = arith.constant 0 : i32
    %c0_i32_0 = arith.constant 0 : i32
    %c0_i32_1 = arith.constant 0 : i32
    return %c0_i32, %c0_i32_0 : i32, i32
  }
  func.func @transform_7(%arg0: i32) -> (i32, i32, i32) {
    %c0_i32 = arith.constant 0 : i32
    %c0_i32_0 = arith.constant 0 : i32
    %c0_i32_1 = arith.constant 0 : i32
    %c0_i32_2 = arith.constant 0 : i32
    return %c0_i32, %c0_i32_0, %c0_i32_1 : i32, i32, i32
  }
  func.func @transform_8(%arg0: i32) -> (i32, i32) {
    %c0_i32 = arith.constant 0 : i32
    %c0_i32_0 = arith.constant 0 : i32
    %c0_i32_1 = arith.constant 0 : i32
    return %c0_i32, %c0_i32_0 : i32, i32
  }
  func.func @transform_9(%arg0: i32) -> (i32, i32, i32) {
    %c0_i32 = arith.constant 0 : i32
    %c0_i32_0 = arith.constant 0 : i32
    %c0_i32_1 = arith.constant 0 : i32
    return %arg0, %c0_i32, %c0_i32_0 : i32, i32, i32
  }
}

</mosaic_0001>

<bundles_post_ra>
// kernel: tpu_custom_call.1
= control target key start
LH: loop header
LB: loop body
LE: loop exit
PB: predicated region body
PF: predicated region fallthrough
CT: control target
= control target key end

     0   :  { %s2896_s0 = inlined_call_operand.vmem [shape: f32[2,8,32], index: 0, kind: input, shape index: {}]   ;;  %s2897_s1 = inlined_call_operand.hbm [shape: f32[2,16,64], index: 1, kind: input, shape index: {}]   ;;  %s2898_s2 = inlined_call_operand.hbm [shape: f32[32,64], index: 2, kind: input, shape index: {}]   ;;  %s2899_s3 = inlined_call_operand.vmem [shape: f32[16,8], index: 3, kind: input, shape index: {}]   ;;  %s2900_s4 = inlined_call_operand.hbm [shape: f32[3,64,64], index: 4, kind: input, shape index: {}]   ;;  %s2901_s5 = inlined_call_operand.hbm [shape: f32[3,64,64], index: 5, kind: input, shape index: {}]   ;;  %s2902_s6 = inlined_call_operand.vmem [shape: f32[1,64], index: 6, kind: input, shape index: {}]   ;;  %s2903_s7 = inlined_call_operand.hbm [shape: f32[3,64,64], index: 7, kind: input, shape index: {}]   ;;  %s2904_s8 = inlined_call_operand.vmem [shape: f32[1,64], index: 8, kind: input, shape index: {}]   ;;  %s2905_s9 = inlined_call_operand.hbm [shape: f32[2,16,64], index: 9, kind: output, shape index: {}]  }
   0x1   :  { %2912 = sst [smem:[#allocation18_spill]] %s2905_s9 }
   0x2   :  { %14 = vsyncpa [#allocation3], 0 }
   0x3   :  { %16 = vsyncpa [#allocation3 + $0x1], 0 }
   0x4   :  { %17 = vsyncpa [#allocation6], 0 }
   0x5   :  { %18 = vsyncpa [#allocation9], 0 }
   0x6   :  { %19 = vsyncpa [#allocation4], 0 }
   0x7   :  { %21 = vsyncpa [#allocation4 + $0x1], 0  ;;  %s2499_s30 = smov 0   ;;  %s2501_s10 = smov 0  }
   0x8   :  { %s2503_s11 = smov 0   ;;  %s2505_s12 = smov 0  }
   0x9 LB: > { %2913 = sst [smem:[#allocation16_spill]] %s2422_s30  ;;  %s2520_s13 = sadd.s32 4294967295, %s2434_s12   ;;  %s2434_s12 = sphi %s2505_s12, %s2937_s12   ;;  %s2430_s11 = sphi %s2503_s11, %s2936_s11   ;;  %s2426_s10 = sphi %s2501_s10, %s2935_s10   ;;  %s2422_s30 = sphi %s2499_s30, %s2934_s30  }
   0xa   : > { %s1627_s14 = sadd.s32 4294967294, %s2434_s12   ;;  %p73_p0 = scmp.ne.s32.totalorder %s2426_s10, %s2422_s30 }
   0xb   : > { %p2906_p1 = scmp.eq.s32.totalorder %s2520_s13, 0  ;;  %p250_p3 = scmp.eq.s32.totalorder %s1627_s14, 1 }
   0xc   : > { %p1628_p5 = scmp.ge.s32.totalorder %s2434_s12, 1  ;;  %p257_p7 = scmp.lt.s32.totalorder %s2434_s12, 3 }
   0xd   : > { %p2529_p4 = por %p2906_p1, %p73_p0  ;;  %p2534_p6 = por %p250_p3, %p73_p0 }
   0xe   : > { %p2539_p8 = pnand %p1628_p5, %p257_p7  ;;  %s2436_s18 = smov [#allocation5]  }
   0xf   : > { %s2914_s15 = scalar_select %p2529_p4, 1, 0 }
  0x10   : > { %s2915_s16 = scalar_select %p2534_p6, 1, 0 }
  0x11   : > { %s2917_s17 = scalar_select %p2539_p8, 1, 0 }
  0x12   : > { %2916 = sst [smem:[#allocation17_spill]] %s2915_s16  ;;  %s269_s19 = sshll.u32 %s2436_s18, 4  ;;  %s2543_s19 = int_to_ptr.vmem [resolvable:$true] %s269_s19 }
  0x13   : > { %p2144_p9 = pneg %p2539_p8  ;;  %s2437_s21 = smov [#allocation8]  }
  0x14   : > { %s298_s22 = sshll.u32 %s2437_s21, 4  ;;  %s2438_s23 = smov [#allocation7]   ;;  %s2554_s22 = int_to_ptr.vmem [resolvable:$true] %s298_s22 }
  0x15   : > { %p2550_p11 = pnand %p2144_p9, %p2906_p1  ;;  %s2556_s24 = sshll.u32 %s2438_s23, 4  ;;  %s286_s24 = int_to_ptr.vmem [resolvable:$true] %s2556_s24 }
  0x16   : > { %s2218_s27 = scalar_lea.hbm %s2898_s2, 512 }
  0x17   : > { %p2219_p12 = scmp.ne.s32.totalorder %s2898_s2, %s2218_s27  ;;  %p2566_p13 = pneg %p2550_p11 }
  0x18   : > { %p2225_p5 = scmp.lt.u32.totalorder %s2218_s27, %s2898_s2 }
  0x19   : > { %p2221_p0 = pnand %p2566_p13, %p2219_p12 }
  0x1b   : > { %p2222_p3 = pneg %p2221_p0 }
  0x1d   : > { %p2227_p7 = pnand %p2225_p5, %p2222_p3 }
  0x1f   : > { %2230 = shalt.err (!%p2227_p7)
}
  0x20   : > { %s2231_s23 = scalar_lea.vmem %s2543_s19, 512  ;;  %p2239_p2 = scmp.lt.s32.totalorder %s2543_s19, %s2543_s19 }
  0x21   : > { %p2232_p9 = scmp.ne.s32.totalorder %s2543_s19, %s2231_s23  ;;  %p2240_p6 = scmp.lt.s32.totalorder %s2231_s23, %s2231_s23 }
  0x23   : > { %p2234_p10 = pnand %p2232_p9, %p2566_p13  ;;  %p2241_p12 = por %p2240_p6, %p2239_p2 }
  0x25   : > { %p2235_p1 = pneg %p2234_p10 }
  0x27   : > { %p2242_p0 = pnand %p2241_p12, %p2235_p1 }
  0x29   : > { %2245 = shalt.err (!%p2242_p0)
}
  0x2a   : > { %s2439_s25 = smov 128   ;;  %s2440_s26 = smov 8  }
  0x2b   : > { %2147 = dma.hbm_to_vmem [thread:$0]  (!%p2550_p11), %s2898_s2, 512, %s2543_s19, [#allocation6], %s2439_s25, %s2439_s25, %s2440_s26  }
  0x2c   : > { %s2246_s21 = scalar_lea.hbm %s2901_s5, 3072 }
  0x2d   : > { %p2247_p1 = scmp.ne.s32.totalorder %s2901_s5, %s2246_s21  ;;  %p2253_p10 = scmp.lt.u32.totalorder %s2246_s21, %s2901_s5 }
  0x2f   : > { %p2249_p2 = pnand %p2247_p1, %p2566_p13 }
  0x31   : > { %p2250_p6 = pneg %p2249_p2 }
  0x33   : > { %p2255_p3 = pnand %p2253_p10, %p2250_p6 }
  0x35   : > { %2258 = shalt.err (!%p2255_p3)
}
  0x36   : > { %s2259_s19 = scalar_lea.vmem %s2554_s22, 3072  ;;  %p2267_p12 = scmp.lt.s32.totalorder %s2554_s22, %s2554_s22 }
  0x37   : > { %p2260_p5 = scmp.ne.s32.totalorder %s2554_s22, %s2259_s19  ;;  %p2268_p0 = scmp.lt.s32.totalorder %s2259_s19, %s2259_s19 }
  0x39   : > { %p2262_p7 = pnand %p2260_p5, %p2566_p13  ;;  %p2269_p1 = por %p2268_p0, %p2267_p12 }
  0x3b   : > { %p2263_p9 = pneg %p2262_p7 }
  0x3d   : > { %p2270_p2 = pnand %p2269_p1, %p2263_p9 }
  0x3f   : > { %2273 = shalt.err (!%p2270_p2)
}
  0x40   : > { %2153 = dma.hbm_to_vmem [thread:$0]  (!%p2550_p11), %s2901_s5, 3072, %s2554_s22, [#allocation9], %s2439_s25, %s2439_s25, %s2440_s26  }
  0x41   : > { %s2274_s28 = scalar_lea.hbm %s2900_s4, 3072 }
  0x42   : > { %p2275_p6 = scmp.ne.s32.totalorder %s2900_s4, %s2274_s28  ;;  %p2281_p5 = scmp.lt.u32.totalorder %s2274_s28, %s2900_s4 }
  0x44   : > { %p2277_p10 = pnand %p2275_p6, %p2566_p13 }
  0x46   : > { %p2278_p3 = pneg %p2277_p10 }
  0x48   : > { %p2283_p7 = pnand %p2281_p5, %p2278_p3 }
  0x4a   : > { %2286 = shalt.err (!%p2283_p7)
}
  0x4b   : > { %s2287_s19 = scalar_lea.vmem %s286_s24, 3072  ;;  %p2295_p1 = scmp.lt.s32.totalorder %s286_s24, %s286_s24 }
  0x4c   : > { %p2288_p9 = scmp.ne.s32.totalorder %s286_s24, %s2287_s19  ;;  %p2296_p2 = scmp.lt.s32.totalorder %s2287_s19, %s2287_s19 }
  0x4e   : > { %p2290_p12 = pnand %p2288_p9, %p2566_p13  ;;  %p2297_p4 = por %p2296_p2, %p2295_p1 }
  0x50   : > { %p2291_p0 = pneg %p2290_p12 }
  0x52   : > { %p2298_p8 = pnand %p2297_p4, %p2291_p0 }
  0x54   : > { %2301 = shalt.err (!%p2298_p8)
}
  0x55   : > { %2150 = dma.hbm_to_vmem [thread:$0]  (!%p2550_p11), %s2900_s4, 3072, %s286_s24, [#allocation6], %s2439_s25, %s2439_s25, %s2440_s26  }
  0x56   : > { %s2441_s30 = smov [#allocation10]   ;;  %s2302_s29 = scalar_lea.hbm %s2903_s7, 3072 }
  0x57   : > { %s314_s16 = sshll.u32 %s2441_s30, 4  ;;  %p2303_p4 = scmp.ne.s32.totalorder %s2903_s7, %s2302_s29  ;;  %s315_s16 = int_to_ptr.vmem [resolvable:$true] %s314_s16 }
  0x58   : > { %p2309_p10 = scmp.lt.u32.totalorder %s2302_s29, %s2903_s7 }
  0x59   : > { %p2305_p8 = pnand %p2303_p4, %p2566_p13 }
  0x5b   : > { %p2306_p6 = pneg %p2305_p8 }
  0x5d   : > { %p2311_p3 = pnand %p2309_p10, %p2306_p6 }
  0x5f   : > { %2314 = shalt.err (!%p2311_p3)
}
  0x60   : > { %s2315_s24 = scalar_lea.vmem %s315_s16, 3072  ;;  %p2323_p12 = scmp.lt.s32.totalorder %s315_s16, %s315_s16 }
  0x61   : > { %p2316_p5 = scmp.ne.s32.totalorder %s315_s16, %s2315_s24  ;;  %p2324_p0 = scmp.lt.s32.totalorder %s2315_s24, %s2315_s24 }
  0x63   : > { %p2318_p7 = pnand %p2316_p5, %p2566_p13  ;;  %p2325_p1 = por %p2324_p0, %p2323_p12 }
  0x65   : > { %p2319_p9 = pneg %p2318_p7 }
  0x67   : > { %p2326_p2 = pnand %p2325_p1, %p2319_p9 }
  0x69   : > { %2329 = shalt.err (!%p2326_p2)
}
  0x6a   : > { %2156 = dma.hbm_to_vmem [thread:$0]  (!%p2550_p11), %s2903_s7, 3072, %s315_s16, [#allocation9], %s2439_s25, %s2439_s25, %s2440_s26  }
  0x6b   : > { %s2660_s14 = sadd.s32 1, %s2434_s12   ;;  %s60_s20 = sadd.s32 1, %s2430_s11 }
  0x6c   : > { %s57_s30 = ssub.s32 %s2434_s12, %s2660_s14  ;;  %p67_p13 = scmp.ne.s32.totalorder %s2430_s11, %s2426_s10 }
  0x6d   : > { %p58_p4 = scmp.eq.s32.totalorder %s57_s30, 0  ;;  %p68_p8 = scmp.eq.s32.totalorder %s2434_s12, 0 }
  0x6e   : > { %p2920_p6 = scmp.eq.s32.totalorder %s2520_s13, 1  ;;  %p2169_p3 = scmp.lt.s32.totalorder %s2434_s12, 2 }
  0x6f   : > { %s2676_s28 = scalar_select %p58_p4, %s2430_s11, %s60_s20  }
  0x70   : > { %p2670_p10 = por %p2920_p6, %p67_p13  ;;  %p69_p5 = por %p68_p8, %p67_p13 }
  0x71   : > { %s338_s29 = sand.u32 1, %s2430_s11   ;;  %s1673_s16 = sshll.u32 %s2434_s12, 8 }
  0x72   : > { %s1634_s18 = sshll.u32 %s338_s29, 4  ;;  %s2683_s19 = scalar_lea.hbm %s2897_s1, %s1673_s16 }
  0x73   : > { %s342_s24 = scalar_lea.vmem [#allocation2], %s1634_s18  ;;  %p2687_p11 = pnand %p2169_p3, %p69_p5 }
  0x74   : > { %s349_s22 = sshll.u32 %s342_s24, 4  ;;  %s2691_s20 = scalar_lea.sflag [#allocation3], %s338_s29  ;;  %s2685_s22 = int_to_ptr.vmem [resolvable:$true] %s349_s22 }
  0x75   : > { %s2330_s30 = scalar_lea.hbm %s2683_s19, 256  ;;  %p2332_p9 = pneg %p2687_p11 }
  0x76   : > { %p2331_p7 = scmp.ne.s32.totalorder %s2683_s19, %s2330_s30  ;;  %s2335_s21 = scalar_lea.hbm %s2897_s1, 512 }
  0x77   : > { %p2336_p1 = scmp.lt.u32.totalorder %s2683_s19, %s2897_s1  ;;  %p2337_p2 = scmp.lt.u32.totalorder %s2335_s21, %s2330_s30 }
  0x78   : > { %p2333_p12 = pnand %p2332_p9, %p2331_p7  ;;  %p2339_p4 = scmp.lt.u32.totalorder %s2330_s30, %s2683_s19 }
  0x79   : > { %p2338_p13 = por %p2337_p2, %p2336_p1 }
  0x7a   : > { %p2334_p0 = pneg %p2333_p12 }
  0x7b   : > { %p2340_p8 = por %p2339_p4, %p2338_p13 }
  0x7d   : > { %p2341_p6 = pnand %p2340_p8, %p2334_p0 }
  0x7f   : > { %2344 = shalt.err (!%p2341_p6)
}
  0x80   : > { %s2345_s29 = scalar_lea.vmem %s2685_s22, 256  ;;  %s2442_s18 = smov [#allocation2]  }
  0x81   : > { %p2346_p3 = scmp.ne.s32.totalorder %s2685_s22, %s2345_s29  ;;  %s2350_s16 = sshll.u32 %s2442_s18, 4  ;;  %s2351_s16 = int_to_ptr.vmem [resolvable:$false] %s2350_s16 }
  0x82   : > { %s2352_s23 = scalar_lea.vmem %s2351_s16, 512  ;;  %p2353_p12 = scmp.lt.s32.totalorder %s2685_s22, %s2351_s16 }
  0x83   : > { %p2348_p5 = pnand %p2346_p3, %p2332_p9  ;;  %p2354_p1 = scmp.lt.s32.totalorder %s2352_s23, %s2345_s29 }
  0x85   : > { %p2349_p7 = pneg %p2348_p5  ;;  %p2355_p2 = por %p2354_p1, %p2353_p12 }
  0x87   : > { %p2356_p13 = pnand %p2355_p2, %p2349_p7 }
  0x89   : > { %2359 = shalt.err (!%p2356_p13)
}
  0x8a   : > { %2160 = dma.hbm_to_vmem [thread:$0]  (!%p2687_p11), %s2683_s19, 256, %s2685_s22, %s2691_s20, %s2439_s25, %s2439_s25, %s2440_s26  }
  0x8b   : > { %p2923_p9 = scmp.ne.s32.totalorder %s2917_s17, 0 }
  0x8c   : > { %s2725_s30 = sand.u32 (!%p2923_p9), 1, %s2426_s10   ;;  %p2924_p0 = scmp.ne.s32.totalorder (!%p2923_p9), %s2914_s15, 0 }
  0x8d   : > { %361 = sbr.rel (%p2923_p9) target bundleno = 1111 (0x457), region = 56  ;;  %s1638_s21 = sshll.u32 (!%p2923_p9), %s2725_s30, 4 }
  0x8e   : > { %s364_s24 = scalar_lea.sflag (!%p2923_p9), [#allocation3], %s2725_s30  ;;  %s2731_s9 = scalar_lea.vmem (!%p2923_p9), [#allocation2], %s1638_s21 }
  0x94   : > { %2405 = dma.done.wait (%p2924_p0), %s364_s24, 256  }
  0x95   : > { %2407 = vsyncadd (%p2924_p0), %s364_s24, 4294967040  ;;  %p2925_p11 = scmp.eq.s32.totalorder %s2520_s13, 0 }
  0x97   : > { %2409 = dma.done.wait (%p2925_p11), [#allocation6], 3584   ;;  %p2926_p4 = pmov %p2925_p11 }
  0x99   : > { %2411 = vsyncadd (%p2926_p4), [#allocation6], 4294963712  ;;  %p2927_p8 = pmov %p2926_p4 }
  0x9a   : > { %p2928_p6 = pmov %p2926_p4 }
  0x9b   : > { %2413 = dma.done.wait (%p2927_p8), [#allocation9], 6144  }
  0x9c   : > { %2415 = vsyncadd (%p2928_p6), [#allocation9], 4294961152  ;;  %p422_p3 = scmp.lt.s32.totalorder %s2520_s13, 1  ;;  %v2443_v0 = vmov 0.0|0.0   ;;  %vm2444_vm0 = vmmov 0   ;;  %v2445_v1 = vmov 0.0   ;;  %v593_v13 = vlaneseq }
  0x9d   : > { %1960 = vmatprep.subr.bf16.mxu0 %v2443_v0  ;;  %1781 = vmatprep.mubr.msk.f32.mxu0 %vm2444_vm0, %v2445_v1  ;;  %v427_v2 = vld [vmem:[#allocation5] sm:$0xff]  ;;  %v428_v3 = vld [vmem:[#allocation5 + $0x8] sm:$0xff]  ;;  %v429_v4 = vld [vmem:[#allocation5 + $0x10] sm:$0xff]  ;;  %vm431_vm1 = vcmask 261120   ;;  %vm507_vm2 = vcmask 64512   ;;  %vm631_vm4 = vcmask 523264  }
  0x9e   : > { %s423_s15 = scalar_select %p422_p3, %s2520_s13, 1  ;;  %v1961_v5 = vpack.c.bf16 %v428_v3, %v427_v2  ;;  %v430_v6 = vld [vmem:[#allocation5 + $0x18] sm:$0xff]  ;;  %v505_v9 = vld [vmem:[%s2899_s3] sm:$0xff]  ;;  %v610_v11 = vld [vmem:[#allocation7 + $0x8] sm:$0xff]  ;;  %v2757_v20 = vshrl.u32 %v593_v13, 7 }
  0x9f   : > { %v1964_v7 = vpack.c.bf16 %v430_v6, %v429_v4  ;;  %v609_v10 = vld [vmem:[#allocation7] sm:$0xff]  ;;  %v611_v12 = vld [vmem:[#allocation7 + $0x10] sm:$0xff]  ;;  %v612_v15 = vld [vmem:[#allocation7 + $0x18] sm:$0xff]  ;;  %s1674_s25 = sshll.u32 %s2520_s13, 8  ;;  %s2929_s22 = sld [smem:[#allocation18_spill]] }
  0xa0   : > { %s1644_s17 = sshll.u32 %s423_s15, 3  ;;  %1962 = vmatpush3.bf16.msra.mxu0 %v1961_v5  ;;  %v1982_v14 = vpack.c.bf16 %v610_v11, %v609_v10  ;;  %v1986_v16 = vpack.c.bf16 %v612_v15, %v611_v12  ;;  %v613_v17 = vld [vmem:[#allocation7 + $0x20] sm:$0xff]  ;;  %v614_v18 = vld [vmem:[#allocation7 + $0x28] sm:$0xff]  ;;  %vm595_vm3 = vcmp.lt.s32.totalorder %v2757_v20, 1  ;;  %v2766_v24 = vadd.s32 4294967295, %v2757_v20  ;;  %v615_v26 = vld [vmem:[#allocation7 + $0x30] sm:$0xff] }
  0xa1   : > { %1963 = vmatprep.subr.bf16.mxu0 %v2443_v0  ;;  %s425_s19 = scalar_lea.vmem %s2896_s0, %s1644_s17  ;;  %v2755_v19 = vld [vmem:[%s2731_s9] sm:$0xff]  ;;  %v2760_v21 = vld [vmem:[%s2731_s9 + $0x8] sm:$0xff]  ;;  %v1990_v25 = vpack.c.bf16 %v614_v18, %v613_v17  ;;  %vm980_vm6 = vcmp.lt.s32.totalorder %v2757_v20, 7  ;;  %s421_s15 = scalar_lea.vmem [#allocation11], %s1638_s21 }
  0xa2   : > { %v426_v8 = vld [vmem:[%s425_s19] sm:$0xff]  ;;  %1983 = vmatprep.subr.bf16.mxu1 %v1982_v14  ;;  %v591_v22 = vrot.slane %v2755_v19, 7  ;;  %v592_v23 = vrot.slane %v2760_v21, 7  ;;  %v616_v27 = vld [vmem:[#allocation7 + $0x38] sm:$0xff]  ;;  %vm601_vm5 = vcmp.ge.s32.totalorder %v2766_v24, 0  ;;  %v796_v32 = vld [vmem:[#allocation7 + $0x48] sm:$0xff] }
  0xa3   : > { %1985 = vmatpush3.bf16.msra.mxu1 %v1982_v14  ;;  %v1994_v30 = vpack.c.bf16 %v616_v27, %v615_v26  ;;  %v795_v31 = vld [vmem:[#allocation7 + $0x40] sm:$0xff]  ;;  %v797_v34 = vld [vmem:[#allocation7 + $0x50] sm:$0xff]  ;;  %v798_v35 = vld [vmem:[#allocation7 + $0x58] sm:$0xff]  ;;  %v978_v10 = vrot.slane %v2755_v19, 1  ;;  %v979_v11 = vrot.slane %v2760_v21, 1  ;;  %s1504_s17 = sshll.u32 %s421_s15, 4  ;;  %s2850_s17 = int_to_ptr.vmem [resolvable:$true] %s1504_s17 }
  0xa4   : > { %1965 = vmatpush3.bf16.msra.mxu0 %v1964_v7  ;;  %1987 = vmatprep.subr.bf16.mxu1 %v1986_v16  ;;  %v597_v28 = vsel %vm595_vm3, %v592_v23, %v591_v22  ;;  %v1998_v33 = vpack.c.bf16 %v796_v32, %v795_v31  ;;  %v596_v36 = vsel %vm595_vm3, %v591_v22, %v592_v23  ;;  %v799_v38 = vld [vmem:[#allocation7 + $0x60] sm:$0xff]  ;;  %v800_v39 = vld [vmem:[#allocation7 + $0x68] sm:$0xff]  ;;  %v801_v41 = vld [vmem:[#allocation7 + $0x70] sm:$0xff]  ;;  %s1491_s13 = scalar_lea.sflag [#allocation4], %s2725_s30  ;;  %s2360_s21 = scalar_lea.vmem %s2850_s17, 256 }
  0xa5   : > { %v607_v29 = vsel %vm601_vm5, %v597_v28, 0.0  ;;  %v2002_v37 = vpack.c.bf16 %v798_v35, %v797_v34  ;;  %v2006_v40 = vpack.c.bf16 %v800_v39, %v799_v38  ;;  %v802_v42 = vld [vmem:[#allocation7 + $0x78] sm:$0xff]  ;;  %v887_v44 = vld [vmem:[#allocation8 + $0x40] sm:$0xff]  ;;  %v888_v45 = vld [vmem:[#allocation8 + $0x48] sm:$0xff]  ;;  %v981_v22 = vsel %vm980_vm6, %v978_v10, %v979_v11  ;;  %s2848_s20 = scalar_lea.hbm %s2929_s22, %s1674_s25  ;;  %p2361_p5 = scmp.ne.s32.totalorder %s2850_s17, %s2360_s21 }
  0xa6   : > { %1824 = vmatprep.mubr.msk.f32.mxu1 %vm631_vm4, %v607_v29  ;;  %v2010_v43 = vpack.c.bf16 %v802_v42, %v801_v41  ;;  %v2014_v46 = vpack.c.bf16 %v888_v45, %v887_v44  ;;  %v889_v47 = vld [vmem:[#allocation8 + $0x50] sm:$0xff]  ;;  %v890_v48 = vld [vmem:[#allocation8 + $0x58] sm:$0xff]  ;;  %v891_v50 = vld [vmem:[#allocation8 + $0x60] sm:$0xff]  ;;  %v598_v34 = vadd.s32 8, %v2757_v20  ;;  %v982_v39 = vsel %vm980_vm6, %v979_v11, %v978_v10  ;;  %s2446_s29 = smov [#allocation11]  }
  0xa7   : > { %1782 = vmatmul.mubr.msk.f32.vlgmr.msra.gmra.mrb[0].mxu0 %vm431_vm1, %v426_v8  ;;  %1989 = vmatpush3.bf16.msra.mxu1 %v1986_v16  ;;  %v2018_v49 = vpack.c.bf16 %v890_v48, %v889_v47  ;;  %v892_v51 = vld [vmem:[#allocation8 + $0x68] sm:$0xff]  ;;  %v893_v53 = vld [vmem:[#allocation8 + $0x70] sm:$0xff]  ;;  %v894_v54 = vld [vmem:[#allocation8 + $0x78] sm:$0xff]  ;;  %p2362_p7 = pnand %p2361_p5, %p2670_p10  ;;  %s2364_s18 = sshll.u32 %s2446_s29, 4  ;;  %s2365_s18 = int_to_ptr.vmem [resolvable:$false] %s2364_s18 }
  0xa8   : > { %1786 = vmatprep.mubr.msk.f32.mxu0 %vm507_vm2, %v505_v9  ;;  %1991 = vmatprep.subr.bf16.mxu1 %v1990_v25  ;;  %v2022_v52 = vpack.c.bf16 %v892_v51, %v891_v50  ;;  %v2026_v55 = vpack.c.bf16 %v894_v54, %v893_v53  ;;  %v623_v56 = vld [vmem:[#allocation8] sm:$0xff]  ;;  %v624_v57 = vld [vmem:[#allocation8 + $0x8] sm:$0xff]  ;;  %v625_v58 = vld [vmem:[#allocation8 + $0x10] sm:$0xff]  ;;  %v2806_v38 = vadd.s32 1, %v598_v34  ;;  %s2366_s16 = scalar_lea.vmem %s2365_s18, 512  ;;  %p2367_p1 = scmp.lt.s32.totalorder %s2850_s17, %s2365_s18 }
  0xa9   : > { %v626_v59 = vld [vmem:[#allocation8 + $0x18] sm:$0xff]  ;;  %v1966_v60 = vpack.c.bf16 %v624_v57, %v623_v56  ;;  %v506_v62 = vld [vmem:[%s2899_s3 + $0x8] sm:$0xff]  ;;  %v627_v1 = vld [vmem:[#allocation8 + $0x20] sm:$0xff]  ;;  %p2363_p12 = pneg %p2362_p7  ;;  %p2368_p2 = scmp.lt.s32.totalorder %s2366_s16, %s2360_s21 }
  0xaa   : > { %v1970_v0 = vpack.c.bf16 %v626_v59, %v625_v58  ;;  %v628_v2 = vld [vmem:[#allocation8 + $0x28] sm:$0xff]  ;;  %v994_v4 = vld [vmem:[#allocation7 + $0x80] sm:$0xff]  ;;  %v629_v7 = vld [vmem:[#allocation8 + $0x30] sm:$0xff]  ;;  %vm988_vm7 = vcmp.lt.s32.totalorder %v2806_v38, 16 }
  0xab   : > { %1993 = vmatpush3.bf16.msra.mxu1 %v1990_v25  ;;  %v1974_v3 = vpack.c.bf16 %v628_v2, %v627_v1  ;;  %v995_v5 = vld [vmem:[#allocation7 + $0x88] sm:$0xff]  ;;  %v630_v8 = vld [vmem:[#allocation8 + $0x38] sm:$0xff]  ;;  %v996_v12 = vld [vmem:[#allocation7 + $0x90] sm:$0xff]  ;;  %p2369_p13 = por %p2368_p2, %p2367_p1 }
  0xac   : > { %1995 = vmatprep.subr.bf16.mxu1 %v1994_v30  ;;  %v2030_v6 = vpack.c.bf16 %v995_v5, %v994_v4  ;;  %v1978_v9 = vpack.c.bf16 %v630_v8, %v629_v7  ;;  %v997_v13 = vld [vmem:[#allocation7 + $0x98] sm:$0xff]  ;;  %v998_v26 = vld [vmem:[#allocation7 + $0xa0] sm:$0xff]  ;;  %v1000_v32 = vld [vmem:[#allocation7 + $0xb0] sm:$0xff] }
  0xad   : > { %v2034_v18 = vpack.c.bf16 %v997_v13, %v996_v12  ;;  %v1094_v41 = vld [vmem:[#allocation8 + $0x90] sm:$0xff]  ;;  %v1095_v42 = vld [vmem:[#allocation8 + $0x98] sm:$0xff]  ;;  %v1096_v45 = vld [vmem:[#allocation8 + $0xa0] sm:$0xff]  ;;  %p2370_p9 = pnand %p2369_p13, %p2363_p12 }
  0xae   : > { %v2050_v44 = vpack.c.bf16 %v1095_v42, %v1094_v41  ;;  %v1098_v48 = vld [vmem:[#allocation8 + $0xb0] sm:$0xff]  ;;  %v1210_v53 = vld [vmem:[#allocation10 + $0x48] sm:$0xff]  ;;  %v1212_v56 = vld [vmem:[#allocation10 + $0x58] sm:$0xff] }
  0xaf   : > { %1997 = vmatpush3.bf16.msra.mxu1 %v1994_v30  ;;  %v1211_v54 = vld [vmem:[#allocation10 + $0x50] sm:$0xff]  ;;  %v1213_v58 = vld [vmem:[#allocation10 + $0x60] sm:$0xff]  ;;  %v1214_v59 = vld [vmem:[#allocation10 + $0x68] sm:$0xff] }
  0xb0   : > { %1999 = vmatprep.subr.bf16.mxu1 %v1998_v33  ;;  %v2066_v57 = vpack.c.bf16 %v1212_v56, %v1211_v54  ;;  %v1201_v1 = vld [vmem:[#allocation10 + $0x8] sm:$0xff]  ;;  %v1202_v12 = vld [vmem:[#allocation10 + $0x10] sm:$0xff]  ;;  %v1203_v13 = vld [vmem:[#allocation10 + $0x18] sm:$0xff] }
  0xb1   : > { %v1386_v34 = vld [vmem:[#allocation10 + $0x80] sm:$0xff]  ;;  %v1389_v20 = vld [vmem:[#allocation10 + $0x98] sm:$0xff]  ;;  %v1392_v42 = vld [vmem:[#allocation10 + $0xb0] sm:$0xff] }
  0xb2   : > { %1825 = vmatmul.mubr.msk.f32.vlgmr.msra.gmra.mrb[0].mxu1 %vm631_vm4, %v596_v36  ;;  %v1092_v36 = vld [vmem:[#allocation8 + $0x80] sm:$0xff] }
  0xb3   : > { %2001 = vmatpush3.bf16.msra.mxu1 %v1998_v33  ;;  %1843 = vmatprep.mubr.msk.f32.mxu1 %vm631_vm4, %v2755_v19  ;;  %v999_v19 = vld [vmem:[#allocation7 + $0xa8] sm:$0xff]  ;;  %v1001_v33 = vld [vmem:[#allocation7 + $0xb8] sm:$0xff]  ;;  %v1390_v24 = vld [vmem:[#allocation10 + $0xa0] sm:$0xff] }
  0xb4   : > { %2003 = vmatprep.subr.bf16.mxu1 %v2002_v37  ;;  %v2038_v30 = vpack.c.bf16 %v999_v19, %v998_v26  ;;  %v2042_v35 = vpack.c.bf16 %v1001_v33, %v1000_v32  ;;  %v1205_v26 = vld [vmem:[#allocation10 + $0x28] sm:$0xff]  ;;  %v1207_v32 = vld [vmem:[#allocation10 + $0x38] sm:$0xff] }
  0xb7   : > { %2005 = vmatpush3.bf16.msra.mxu1 %v2002_v37  ;;  %v1093_v37 = vld [vmem:[#allocation8 + $0x88] sm:$0xff] }
  0xb8   : > { %2007 = vmatprep.subr.bf16.mxu1 %v2006_v40 }
  0xbb   : > { %2009 = vmatpush3.bf16.msra.mxu1 %v2006_v40  ;;  %v2046_v40 = vpack.c.bf16 %v1093_v37, %v1092_v36  ;;  %v1388_v37 = vld [vmem:[#allocation10 + $0x90] sm:$0xff] }
  0xbc   : > { %2011 = vmatprep.subr.bf16.mxu1 %v2010_v43 }
  0xbf   : > { %2013 = vmatpush3.bf16.msra.mxu1 %v2010_v43  ;;  %v992_v43 = vsel %vm988_vm7, %v982_v39, 0.0  ;;  %v2098_v39 = vpack.c.bf16 %v1389_v20, %v1388_v37 }
  0xc0   : > { %2015 = vmatprep.subr.bf16.mxu1 %v2014_v46 }
  0xc2   : > { %1844 = vmatmul.mubr.msk.f32.vlgmr.msra.gmra.mrb[0].mxu1 %vm631_vm4, %v2760_v21 }
  0xc3   : > { %2017 = vmatpush3.bf16.msra.mxu1 %v2014_v46  ;;  %v1097_v46 = vld [vmem:[#allocation8 + $0xa8] sm:$0xff] }
  0xc4   : > { %2019 = vmatprep.subr.bf16.mxu1 %v2018_v49  ;;  %v2054_v47 = vpack.c.bf16 %v1097_v46, %v1096_v45  ;;  %v1667_v46 = vld [vmem:[%s2904_s8] ss:$0 sm:$0xff] }
  0xc7   : > { %2021 = vmatpush3.bf16.msra.mxu1 %v2018_v49  ;;  %v1099_v49 = vld [vmem:[#allocation8 + $0xb8] sm:$0xff] }
  0xc8   : > { %2023 = vmatprep.subr.bf16.mxu1 %v2022_v52  ;;  %v2058_v50 = vpack.c.bf16 %v1099_v49, %v1098_v48 }
  0xcb   : > { %2025 = vmatpush3.bf16.msra.mxu1 %v2022_v52  ;;  %v1209_v52 = vld [vmem:[#allocation10 + $0x40] sm:$0xff] }
  0xcc   : > { %2027 = vmatprep.subr.bf16.mxu1 %v2026_v55 }
  0xcf   : > { %2029 = vmatpush3.bf16.msra.mxu1 %v2026_v55  ;;  %v2062_v55 = vpack.c.bf16 %v1210_v53, %v1209_v52 }
  0xd0   : > { %2031 = vmatprep.subr.bf16.mxu1 %v2030_v6 }
 0x17a   : > { %v501_v61 = vpop.f32.mrb[0].mxu0 }
 0x17b   : > { %v1783_v63 = vpop.f32.mrb[1].mxu0  ;;  %1784 = vmatprep.subr.mxu0 %v501_v61 }
 0x17c   : > { %1785 = vmatpush3.msra.mxu0 %v501_v61  ;;  %v1215_v61 = vld [vmem:[#allocation10 + $0x70] sm:$0xff] }
 0x17d   : > { %1787 = vmatmul.mubr.msk.f32.vlgmr.msra.gmra.mrb[2].mxu0 %vm507_vm2, %v506_v62  ;;  %1967 = vmatprep.subr.bf16.mxu0 %v1966_v60  ;;  %v1216_v62 = vld [vmem:[#allocation10 + $0x78] sm:$0xff] }
 0x17e   : > { %1969 = vmatpush3.bf16.msra.mxu0 %v1966_v60  ;;  %v2070_v60 = vpack.c.bf16 %v1214_v59, %v1213_v58  ;;  %v2074_v63 = vpack.c.bf16 %v1216_v62, %v1215_v61 }
 0x17f   : > { %1971 = vmatprep.subr.bf16.mxu0 %v1970_v0 }
 0x182   : > { %1973 = vmatpush3.bf16.msra.mxu0 %v1970_v0  ;;  %v1200_v0 = vld [vmem:[#allocation10] sm:$0xff] }
 0x183   : > { %1975 = vmatprep.subr.bf16.mxu0 %v1974_v3  ;;  %v2078_v2 = vpack.c.bf16 %v1201_v1, %v1200_v0 }
 0x186   : > { %1977 = vmatpush3.bf16.msra.mxu0 %v1974_v3 }
 0x187   : > { %1979 = vmatprep.subr.bf16.mxu0 %v1978_v9 }
 0x18a   : > { %1981 = vmatpush3.bf16.msra.mxu0 %v1978_v9 }
 0x18b   : > { %2063 = vmatprep.subr.bf16.mxu0 %v2062_v55 }
 0x250   : > { %v1788_v14 = vpop.f32.mrb[2].mxu0 }
 0x251   : > { %v618_v15 = vrot.slane %v1788_v14, 7  ;;  %v1086_v16 = vrot.slane %v1788_v14, 1  ;;  %v580_v17 = vpop.f32.mrb[3].mxu0 }
 0x252   : > { %v617_v23 = vrot.slane %v580_v17, 7  ;;  %v1085_v25 = vrot.slane %v580_v17, 1  ;;  %1862 = vmatprep.mubr.msk.f32.mxu1 %vm631_vm4, %v580_v17 }
 0x253   : > { %1863 = vmatmul.mubr.msk.f32.vlgmr.msra.gmra.mrb[0].mxu1 %vm631_vm4, %v1788_v14 }
 0x254   : > { %2033 = vmatpush3.bf16.msra.mxu1 %v2030_v6  ;;  %v620_v21 = vsel %vm595_vm3, %v618_v15, %v617_v23  ;;  %v619_v27 = vsel %vm595_vm3, %v617_v23, %v618_v15  ;;  %1881 = vmatprep.mubr.msk.f32.mxu1 %vm631_vm4, %v981_v22  ;;  %v1087_v28 = vsel %vm980_vm6, %v1085_v25, %v1086_v16  ;;  %v1660_v6 = vld [vmem:[%s2902_s6] ss:$0 sm:$0xff] }
 0x255   : > { %v621_v29 = vsel %vm601_vm5, %v620_v21, 0.0  ;;  %2035 = vmatprep.subr.bf16.mxu1 %v2034_v18  ;;  %v1088_v31 = vsel %vm980_vm6, %v1086_v16, %v1085_v25  ;;  %v1204_v25 = vld [vmem:[#allocation10 + $0x20] sm:$0xff] }
 0x256   : > { %1805 = vmatprep.mubr.msk.f32.mxu0 %vm631_vm4, %v621_v29  ;;  %v1090_v51 = vsel %vm988_vm7, %v1088_v31, 0.0  ;;  %v1206_v31 = vld [vmem:[#allocation10 + $0x30] sm:$0xff] }
 0x257   : > { %1806 = vmatmul.mubr.msk.f32.vlgmr.msra.gmra.mrb[4].mxu0 %vm631_vm4, %v619_v27  ;;  %v2090_v33 = vpack.c.bf16 %v1207_v32, %v1206_v31 }
 0x258   : > { %2037 = vmatpush3.bf16.msra.mxu1 %v2034_v18  ;;  %2065 = vmatpush3.bf16.msra.mxu0 %v2062_v55  ;;  %v2082_v18 = vpack.c.bf16 %v1203_v13, %v1202_v12 }
 0x259   : > { %2039 = vmatprep.subr.bf16.mxu1 %v2038_v30  ;;  %2067 = vmatprep.subr.bf16.mxu0 %v2066_v57 }
 0x25c   : > { %2041 = vmatpush3.bf16.msra.mxu1 %v2038_v30  ;;  %2069 = vmatpush3.bf16.msra.mxu0 %v2066_v57  ;;  %v2086_v30 = vpack.c.bf16 %v1205_v26, %v1204_v25 }
 0x25d   : > { %2043 = vmatprep.subr.bf16.mxu1 %v2042_v35  ;;  %2071 = vmatprep.subr.bf16.mxu0 %v2070_v60 }
 0x260   : > { %2045 = vmatpush3.bf16.msra.mxu1 %v2042_v35  ;;  %2073 = vmatpush3.bf16.msra.mxu0 %v2070_v60  ;;  %v1387_v35 = vld [vmem:[#allocation10 + $0x88] sm:$0xff] }
 0x261   : > { %2047 = vmatprep.subr.bf16.mxu1 %v2046_v40  ;;  %2075 = vmatprep.subr.bf16.mxu0 %v2074_v63  ;;  %v2094_v36 = vpack.c.bf16 %v1387_v35, %v1386_v34 }
 0x263   : > { %1882 = vmatmul.mubr.msk.f32.vlgmr.msra.gmra.mrb[0].mxu1 %vm631_vm4, %v992_v43  ;;  %v1393_v43 = vld [vmem:[#allocation10 + $0xb8] sm:$0xff] }
 0x264   : > { %2049 = vmatpush3.bf16.msra.mxu1 %v2046_v40  ;;  %1900 = vmatprep.mubr.msk.f32.mxu1 %vm631_vm4, %v1087_v28  ;;  %v1391_v40 = vld [vmem:[#allocation10 + $0xa8] sm:$0xff] }
 0x265   : > { %2051 = vmatprep.subr.bf16.mxu1 %v2050_v44  ;;  %2077 = vmatpush3.bf16.msra.mxu0 %v2074_v63  ;;  %v2102_v41 = vpack.c.bf16 %v1391_v40, %v1390_v24 }
 0x266   : > { %2079 = vmatprep.subr.bf16.mxu0 %v2078_v2 }
 0x268   : > { %2053 = vmatpush3.bf16.msra.mxu1 %v2050_v44  ;;  %v2106_v44 = vpack.c.bf16 %v1393_v43, %v1392_v42 }
 0x269   : > { %2055 = vmatprep.subr.bf16.mxu1 %v2054_v47 }
 0x26c   : > { %2057 = vmatpush3.bf16.msra.mxu1 %v2054_v47 }
 0x26d   : > { %2059 = vmatprep.subr.bf16.mxu1 %v2058_v50 }
 0x270   : > { %2061 = vmatpush3.bf16.msra.mxu1 %v2058_v50 }
 0x273   : > { %1901 = vmatmul.mubr.msk.f32.vlgmr.msra.gmra.mrb[0].mxu1 %vm631_vm4, %v1090_v51 }
 0x32a   : > { %v1807_v3 = vpop.f32.mrb[4].mxu0 }
 0x32b   : > { %v704_v4 = vpop.f32.mrb[5].mxu0 }
 0x346   : > { %v1902_v5 = vpop.f32.mrb[0].mxu1 }
 0x347   : > { %v2110_v7 = vadd.f32 %v1902_v5, %v1807_v3  ;;  %v1172_v8 = vpop.f32.mrb[1].mxu1 }
 0x348   : > { %v2111_v9 = vadd.f32 %v1172_v8, %v704_v4 }
 0x349   : > { %v1191_v10 = vadd.f32 %v2110_v7, %v1660_v6 }
 0x34a   : > { %v1190_v11 = vadd.f32 %v2111_v9, %v1660_v6 }
 0x34b   : > { %v1193_v14 = vmax.f32 %v1191_v10, 0.0 }
 0x34c   : > { %v1192_v15 = vmax.f32 %v1190_v11, 0.0 }
 0x34d   : > { %v1195_v16 = vrot.slane %v1193_v14, 7  ;;  %v1380_v17 = vrot.slane %v1193_v14, 1 }
 0x34e   : > { %v1194_v22 = vrot.slane %v1192_v15, 7  ;;  %v1379_v23 = vrot.slane %v1192_v15, 1  ;;  %1919 = vmatprep.mubr.msk.f32.mxu0 %vm631_vm4, %v1192_v15 }
 0x34f   : > { %1920 = vmatmul.mubr.msk.f32.vlgmr.msra.gmra.mrb[6].mxu0 %vm631_vm4, %v1193_v14 }
 0x350   : > { %2081 = vmatpush3.bf16.msra.mxu0 %v2078_v2  ;;  %v1197_v19 = vsel %vm595_vm3, %v1195_v16, %v1194_v22  ;;  %v1196_v21 = vsel %vm595_vm3, %v1194_v22, %v1195_v16  ;;  %v1381_v27 = vsel %vm980_vm6, %v1379_v23, %v1380_v17  ;;  %v1382_v28 = vsel %vm980_vm6, %v1380_v17, %v1379_v23 }
 0x351   : > { %2083 = vmatprep.subr.bf16.mxu0 %v2082_v18  ;;  %v1198_v29 = vsel %vm601_vm5, %v1197_v19, 0.0  ;;  %v1384_v45 = vsel %vm988_vm7, %v1382_v28, 0.0 }
 0x352   : > { %1938 = vmatprep.mubr.msk.f32.mxu0 %vm631_vm4, %v1198_v29 }
 0x354   : > { %2085 = vmatpush3.bf16.msra.mxu0 %v2082_v18 }
 0x355   : > { %2087 = vmatprep.subr.bf16.mxu0 %v2086_v30 }
 0x358   : > { %2089 = vmatpush3.bf16.msra.mxu0 %v2086_v30 }
 0x359   : > { %2091 = vmatprep.subr.bf16.mxu0 %v2090_v33 }
 0x35c   : > { %2093 = vmatpush3.bf16.msra.mxu0 %v2090_v33 }
 0x35d   : > { %2095 = vmatprep.subr.bf16.mxu0 %v2094_v36 }
 0x35f   : > { %1939 = vmatmul.mubr.msk.f32.vlgmr.msra.gmra.mrb[6].mxu0 %vm631_vm4, %v1196_v21 }
 0x360   : > { %2097 = vmatpush3.bf16.msra.mxu0 %v2094_v36  ;;  %1957 = vmatprep.mubr.msk.f32.mxu0 %vm631_vm4, %v1381_v27 }
 0x361   : > { %2099 = vmatprep.subr.bf16.mxu0 %v2098_v39 }
 0x364   : > { %2101 = vmatpush3.bf16.msra.mxu0 %v2098_v39 }
 0x365   : > { %2103 = vmatprep.subr.bf16.mxu0 %v2102_v41 }
 0x368   : > { %2105 = vmatpush3.bf16.msra.mxu0 %v2102_v41 }
 0x369   : > { %2107 = vmatprep.subr.bf16.mxu0 %v2106_v44 }
 0x36c   : > { %2109 = vmatpush3.bf16.msra.mxu0 %v2106_v44 }
 0x36f   : > { %1958 = vmatmul.mubr.msk.f32.vlgmr.msra.gmra.mrb[6].mxu0 %vm631_vm4, %v1384_v45 }
 0x442   : > { %v1959_v47 = vpop.f32.mrb[6].mxu0 }
 0x443   : > { %v1485_v48 = vadd.f32 %v1959_v47, %v1667_v46  ;;  %v1466_v49 = vpop.f32.mrb[7].mxu0 }
 0x444   : > { %v1484_v50 = vadd.f32 %v1667_v46, %v1466_v49 }
 0x445   : > { %v1487_v51 = vmax.f32 %v1485_v48, 0.0 }
 0x446   : > { %v1486_v38 = vmax.f32 %v1484_v50, 0.0 }
 0x447   : > { %1489 = vst.msk [vmem:[%s421_s15 + $0x8] sm:$0xff] %vm631_vm4, %v1487_v51 }
 0x448   : > { %1488 = vst.msk [vmem:[%s421_s15] sm:$0xff] %vm631_vm4, %v1486_v38 }
 0x449   : > { %2373 = shalt.err (!%p2370_p9)
}
 0x44a   : > { %s2374_s23 = scalar_lea.hbm %s2848_s20, 256  ;;  %s2378_s15 = scalar_lea.hbm %s2929_s22, 512 }
 0x44b   : > { %p2375_p0 = scmp.ne.s32.totalorder %s2848_s20, %s2374_s23  ;;  %p2379_p8 = scmp.lt.u32.totalorder %s2848_s20, %s2929_s22 }
 0x44c   : > { %p2380_p6 = scmp.lt.u32.totalorder %s2378_s15, %s2374_s23  ;;  %p2382_p5 = scmp.lt.u32.totalorder %s2374_s23, %s2848_s20 }
 0x44d   : > { %p2376_p11 = pnand %p2375_p0, %p2670_p10 }
 0x44e   : > { %p2381_p3 = por %p2380_p6, %p2379_p8 }
 0x44f   : > { %p2377_p4 = pneg %p2376_p11 }
 0x450   : > { %p2383_p7 = por %p2382_p5, %p2381_p3 }
 0x452   : > { %p2384_p12 = pnand %p2383_p7, %p2377_p4 }
 0x454   : > { %2387 = shalt.err (!%p2384_p12)
}
 0x455   : > { %s2447_s19 = smov 128   ;;  %s2448_s21 = smov 8  }
 0x456   : > { %2142 = dma.vmem_to_hbm [thread:$0]  (%p2670_p10), %s2850_s17, 256, %s2848_s20, %s1491_s13, %s2447_s19, %s2447_s19, %s2448_s21  }
 0x457 PF: > { %s2930_s29 = sld [smem:[#allocation16_spill]]  ;;  %s2931_s18 = sld [smem:[#allocation17_spill]] }
 0x458   : > { %p2933_p2 = scmp.ge.s32.totalorder %s2434_s12, 2 }
 0x45d   : > { %s1519_s16 = sand.u32 1, %s2930_s29   ;;  %p2932_p1 = scmp.ne.s32.totalorder %s2931_s18, 0 }
 0x45e   : > { %s1520_s23 = scalar_lea.sflag [#allocation4], %s1519_s16 }
 0x45f   : > { %p2162_p13 = pnand %p2933_p2, %p2932_p1 }
 0x461   : > { %2417 = dma.done.wait (!%p2162_p13), %s1520_s23, 256  }
 0x462   : > { %2419 = vsyncadd (!%p2162_p13), %s1520_s23, 4294967040  ;;  %p24_p9 = scmp.ge.s32.totalorder %s2660_s14, 4   ;;  %s2934_s30 = smov %s2426_s10 }
 0x463   : > { %s2935_s10 = smov %s2430_s11  ;;  %s2936_s11 = smov %s2676_s28 }
 0x464   : > { %s2937_s12 = smov %s2660_s14  ;;  %26 = sbr.rel (!%p24_p9) target bundleno = 9 (0x9), region = 126 }
 0x46b   :  { %1525 = vsyncpa [#allocation3], 1 }
 0x46c   :  { %1527 = vsyncpa [#allocation3 + $0x1], 1 }
 0x46d   :  { %1528 = vsyncpa [#allocation6], 1 }
 0x46e   :  { %1529 = vsyncpa [#allocation9], 1 }
 0x46f   :  { %1530 = vsyncpa [#allocation4], 1 }
 0x470   :  { %1532 = vsyncpa [#allocation4 + $0x1], 1 }

</bundles_post_ra>
